<compile_context>
chip_gen: v6e
topology: v6e:2x2x1
jax: 0.10.0
libtpu: 0.0.40
codegen_flags: <defaults>
</compile_context>

<pallas_src>
import functools
import math

import jax
import jax.numpy as jnp
from jax.experimental import pallas as pl
from jax.experimental.pallas import tpu as pltpu


def _round_up(v, m):
    return ((v + m - 1) // m) * m


def _gat_kernel(x_ref, adj_ref, w_ref, o_ref, *, alpha, concat, fout, adj_is_int):
    """One grid step = `bt` batch elements.

    x_ref   : (bt*N, Fin)     bf16  batch-flattened node features
    adj_ref : (bt, N, N)      int8 (0/1 mask) or float adjacency
    w_ref   : (Fin, Fpad)     bf16  [W | W@a1 | W@a2 | 0-pad]
    o_ref   : (bt, N, Fo_pad)       lane-dense (>=128 wide) padded output
    """
    bt, n, fo_pad = o_ref.shape
    fpad = w_ref.shape[1]

    # Single wide MXU pass (bf16 operands, f32 accumulation).  Columns
    # [fout] / [fout+1] hold the folded a-projections -> Wh1 / Wh2 for free.
    h = jnp.dot(x_ref[...], w_ref[...], preferred_element_type=jnp.float32)
    h3 = h.reshape(bt, n, fpad)                              # (bt, N, Fpad)

    wh1 = h3[:, :, fout:fout + 1]                            # (bt, N, 1)
    wh2 = h3[:, :, fout + 1:fout + 2]                        # (bt, N, 1)

    # e[b, i, j] = Wh1[b, i] + Wh2[b, j]
    e = wh1 + jnp.transpose(wh2, (0, 2, 1))                  # (bt, N, N)
    att = jnp.where(e > 0.0, e, alpha * e)                   # LeakyReLU(alpha)

    # attention * adj, exactly as in the PyTorch module.  For an integer 0/1
    # mask, a single VPU select is the same thing and avoids materializing an
    # int->f32 upcast of the whole adjacency block.
    adj = adj_ref[...]
    if adj_is_int:
        att = jnp.where(adj != 0, att, 0.0)
    else:
        att = att * adj.astype(jnp.float32)

    # softmax over dim=1 of (B, N, N) == axis 1 of this (bt, N, N) block.
    m = jnp.max(att, axis=1, keepdims=True)                  # (bt, 1, N)
    ex = jnp.exp(att - m)
    inv = pl.reciprocal(jnp.sum(ex, axis=1, keepdims=True), approx=True)
    att = ex * inv

    # h' = attention @ h — batched MXU pass, lane-dense (padded) output width.
    hp = jnp.einsum("bij,bjo->bio",
                    att.astype(jnp.bfloat16),
                    h3[:, :, :fo_pad].astype(jnp.bfloat16),
                    preferred_element_type=jnp.float32)      # (bt, N, Fo_pad)

    if concat:                                               # ELU(alpha=1)
        hp = jnp.where(hp > 0.0, hp, jnp.exp(jnp.minimum(hp, 0.0)) - 1.0)

    o_ref[...] = hp.astype(o_ref.dtype)


def _vmem_budget(requested=None):
    """Generation-aware VMEM budget (v5e/v6e: 128 MiB/TC, v7x: 64 MiB/TC)."""
    try:
        cap = pltpu.get_tpu_info().vmem_capacity_bytes
    except Exception:  # off-TPU trace / older API: conservative fallback
        cap = 128 * 1024 * 1024
    budget = (cap * 3) // 4          # ~25% headroom for Mosaic-internal scratch
    if requested is not None:
        budget = min(int(requested), budget)
    return int(budget)


def _estimate_vmem_bytes(bt, N, Fin, Fpad, Fo_pad, adj_itemsize, out_itemsize):
    rows = bt * N
    dbl = 2  # double-buffered pipeline stages
    streams = (rows * Fin * 2 + bt * N * N * adj_itemsize
               + Fin * Fpad * 2 + rows * Fo_pad * out_itemsize) * dbl
    temps = rows * Fpad * 4 + 2 * bt * N * N * 4 + rows * Fo_pad * 4
    return streams + temps


def _pick_block_b(B, N, Fin, Fpad, Fo_pad, adj_itemsize, out_itemsize,
                  max_block_b, vmem_budget):
    """Largest batch block that (a) keeps >= 2 grid steps so both v7x
    TensorCores get work, (b) keeps bt*N sublane / MXU-row aligned, and
    (c) fits the generation-aware VMEM budget."""
    cap = int(vmem_budget * 0.8)

    def fits(d):
        return _estimate_vmem_bytes(d, N, Fin, Fpad, Fo_pad,
                                    adj_itemsize, out_itemsize) <= cap

    def legal(d):
        if B % d:
            return False
        if d > 1 and N % 8:          # batch-flatten reshape needs aligned N
            return False
        return (d * N) % 8 == 0 and fits(d)

    hi = min(max_block_b, B)
    # prefer MXU-row-aligned (128) row blocks, then any sublane-aligned block
    for align in (128, 8):
        for d in range(hi, 0, -1):
            if (d * N) % align == 0 and legal(d) and (B < 2 or B // d >= 2):
                return d
    # last resort: relax the >=2-grid-steps constraint (e.g. B == 1)
    for d in range(hi, 0, -1):
        if legal(d):
            return d
    return B  # full-extent block is always a legal BlockSpec


def gat_forward(x, adj, W, a, *, alpha=0.2, concat=True, block_b=8,
                vmem_limit_bytes=None, adj_buffers=2):
    """Pallas GAT forward (eval mode).

    x: (B, N, Fin), adj: (B, N, N) int8 0/1 mask (or float weights),
    W: (Fin, Fout), a: (2*Fout, 1).  Returns (B, N, Fout) in x.dtype.
    """
    B, N, Fin = x.shape
    Fout = W.shape[1]
    out_dtype = x.dtype

    Fpad = _round_up(Fout + 2, 128)   # augmented weight width: [W | Wa1 | Wa2 | 0]
    Fo_pad = _round_up(Fout, 128)     # lane-dense width the kernel stores

    vmem_budget = _vmem_budget(vmem_limit_bytes)
    bt = _pick_block_b(B, N, Fin, Fpad, Fo_pad,
                       jnp.dtype(adj.dtype).itemsize,
                       jnp.dtype(out_dtype).itemsize,
                       block_b, vmem_budget)
    grid = (B // bt,)

    # Fold `a` into W: two extra MXU output columns give Wh1 / Wh2 for free.
    Wf = W.astype(jnp.float32)
    af = a.astype(jnp.float32).reshape(2 * Fout)
    w_aug = jnp.zeros((Fin, Fpad), jnp.float32)
    w_aug = (w_aug.at[:, :Fout].set(Wf)
                  .at[:, Fout].set(Wf @ af[:Fout])
                  .at[:, Fout + 1].set(Wf @ af[Fout:]))
    w_bf16 = w_aug.astype(jnp.bfloat16)

    # bf16 MXU operands; batch-flattened so x@W is one wide (bt*N, Fin) pass.
    x_flat = x.reshape(B * N, Fin).astype(jnp.bfloat16)

    adj_is_int = bool(jnp.issubdtype(adj.dtype, jnp.integer))
    kernel = functools.partial(_gat_kernel, alpha=float(alpha),
                               concat=bool(concat), fout=int(Fout),
                               adj_is_int=adj_is_int)

    adj_spec_kwargs = {}
    if adj_buffers != 2:  # optional deeper buffering if adj DMA is exposed
        adj_spec_kwargs["pipeline_mode"] = pl.Buffered(adj_buffers)

    out_padded = pl.pallas_call(
        kernel,
        out_shape=jax.ShapeDtypeStruct((B, N, Fo_pad), out_dtype),
        grid=grid,
        in_specs=[
            pl.BlockSpec((bt * N, Fin), lambda g: (g, 0)),
            pl.BlockSpec((bt, N, N), lambda g: (g, 0, 0), **adj_spec_kwargs),
            pl.BlockSpec((Fin, Fpad), lambda g: (0, 0)),
        ],
        out_specs=pl.BlockSpec((bt, N, Fo_pad), lambda g: (g, 0, 0)),
        compiler_params=pltpu.CompilerParams(
            dimension_semantics=("parallel",),
            vmem_limit_bytes=vmem_budget),
    )(x_flat, adj, w_bf16)

    # Drop the lane-padding columns (kernel stores are unmasked this way).
    return out_padded if Fo_pad == Fout else out_padded[..., :Fout]


def _xavier_uniform(key, shape, gain):
    fan_in, fan_out = shape[0], shape[1]
    bound = gain * math.sqrt(6.0 / (fan_in + fan_out))
    return jax.random.uniform(key, shape, jnp.float32, -bound, bound)


def _reference(x, adj, W, a, alpha=0.2, concat=True):
    # Mirrors the PyTorch module exactly: leakyrelu(e) * adj, softmax(dim=1).
    Fout = W.shape[1]
    h = jnp.einsum("bnf,fo->bno", x, W)
    wh1 = jnp.einsum("bno,oi->bni", h, a[:Fout, :])
    wh2 = jnp.einsum("bno,oi->bni", h, a[Fout:, :])
    e = wh1 + jnp.transpose(wh2, (0, 2, 1))
    att = jnp.where(e > 0, e, alpha * e) * adj
    att = jax.nn.softmax(att, axis=1)
    hp = jnp.einsum("bij,bjo->bio", att, h)
    return jax.nn.elu(hp) if concat else hp


if __name__ == "__main__":
    B, N, Fin, Fout = 2, 8, 16, 32
    key = jax.random.PRNGKey(0)
    kx, kadj, kw, ka = jax.random.split(key, 4)

    x = jax.random.normal(kx, (B, N, Fin), jnp.float32)
    # binary adjacency; streamed to the kernel as int8 (4x fewer HBM bytes)
    adj_f32 = (jax.random.uniform(kadj, (B, N, N)) > 0.5).astype(jnp.float32)
    adj_i8 = adj_f32.astype(jnp.int8)

    gain = 1.414
    W = _xavier_uniform(kw, (Fin, Fout), gain)
    a = _xavier_uniform(ka, (2 * Fout, 1), gain)

    out = gat_forward(x, adj_i8, W, a, alpha=0.2, concat=True)
    out = jax.block_until_ready(out)
    assert out.shape == (B, N, Fout)

    ref = _reference(x, adj_f32, W, a, alpha=0.2, concat=True)
    err = jnp.abs(out - ref)
    # bf16 MXU operands (incl. the folded W@a columns) + approx reciprocal
    # loosen tolerance vs a pure-f32 path.
    assert jnp.allclose(out, ref, atol=1e-1, rtol=1e-1), (
        f"max abs err {float(err.max()):.3e}")
    assert float(err.mean()) < 2e-2, f"mean abs err {float(err.mean()):.3e}"

    print("KERNEL_OK")
</pallas_src>

<mosaic_0001>
module attributes {stable_mosaic.version = 11 : i64} {
  func.func @_gat_kernel(%arg0: i32, %arg1: memref<8x16xbf16, #tpu.memory_space<vmem>>, %arg2: memref<1x8x8xi8, #tpu.memory_space<vmem>>, %arg3: memref<16x128xbf16, #tpu.memory_space<vmem>>, %arg4: memref<1x8x128xf32, #tpu.memory_space<vmem>>) attributes {dimension_semantics = [#tpu.dimension_semantics<parallel>], iteration_bounds = array<i64: 2>, scalar_prefetch = 0 : i64, scratch_operands = 0 : i64, tpu.core_type = #tpu.core_type<tc>, window_params = [{transform_indices = @transform_0, window_bounds = array<i64: 8, 16>}, {transform_indices = @transform_1, window_bounds = array<i64: 1, 8, 8>}, {pipeline_mode = #tpu.pipeline_mode<synchronous>, transform_indices = @transform_2, window_bounds = array<i64: 16, 128>}, {transform_indices = @transform_3, window_bounds = array<i64: 1, 8, 128>}]} {
    %c0 = arith.constant 0 : index
    %c0_0 = arith.constant 0 : index
    %0 = vector.load %arg1[%c0, %c0_0] : memref<8x16xbf16, #tpu.memory_space<vmem>>, vector<8x16xbf16>
    %c0_1 = arith.constant 0 : index
    %c0_2 = arith.constant 0 : index
    %1 = vector.load %arg3[%c0_1, %c0_2] : memref<16x128xbf16, #tpu.memory_space<vmem>>, vector<16x128xbf16>
    %cst = arith.constant dense<0.000000e+00> : vector<8x128xf32>
    %2 = tpu.matmul %0, %1, %cst {dimension_numbers = #tpu.dot_dimension_numbers<[1], [0], [0], [1], [0, 0, 1, 1], [], []>} : vector<8x16xbf16>, vector<16x128xbf16>, vector<8x128xf32> -> vector<8x128xf32>
    %3 = vector.shape_cast %2 : vector<8x128xf32> to vector<1x8x128xf32>
    %4 = vector.extract_strided_slice %3 {offsets = [0, 0, 32], sizes = [1, 8, 1], strides = [1, 1, 1]} : vector<1x8x128xf32> to vector<1x8x1xf32>
    %5 = vector.extract_strided_slice %3 {offsets = [0, 0, 33], sizes = [1, 8, 1], strides = [1, 1, 1]} : vector<1x8x128xf32> to vector<1x8x1xf32>
    %6 = tpu.transpose %5, [0, 2, 1] : vector<1x8x1xf32> -> vector<1x1x8xf32>
    %7 = vector.broadcast %4 : vector<1x8x1xf32> to vector<1x8x8xf32>
    %8 = vector.broadcast %6 : vector<1x1x8xf32> to vector<1x8x8xf32>
    %9 = arith.addf %7, %8 : vector<1x8x8xf32>
    %cst_3 = arith.constant 0.000000e+00 : f32
    %10 = vector.broadcast %cst_3 : f32 to vector<1x8x8xf32>
    %11 = arith.cmpf ogt, %9, %10 : vector<1x8x8xf32>
    %cst_4 = arith.constant 2.000000e-01 : f32
    %12 = vector.broadcast %cst_4 : f32 to vector<1x8x8xf32>
    %13 = arith.mulf %12, %9 : vector<1x8x8xf32>
    %14 = arith.select %11, %9, %13 : vector<1x8x8xi1>, vector<1x8x8xf32>
    %c0_5 = arith.constant 0 : index
    %c0_6 = arith.constant 0 : index
    %c0_7 = arith.constant 0 : index
    %15 = vector.load %arg2[%c0_5, %c0_6, %c0_7] : memref<1x8x8xi8, #tpu.memory_space<vmem>>, vector<1x8x8xi8>
    %c0_i8 = arith.constant 0 : i8
    %16 = vector.broadcast %c0_i8 : i8 to vector<1x8x8xi8>
    %17 = arith.cmpi ne, %15, %16 : vector<1x8x8xi8>
    %cst_8 = arith.constant 0.000000e+00 : f32
    %18 = vector.broadcast %cst_8 : f32 to vector<1x8x8xf32>
    %19 = arith.select %17, %14, %18 : vector<1x8x8xi1>, vector<1x8x8xf32>
    %cst_9 = arith.constant dense<0xFF800000> : vector<1x8xf32>
    %20 = vector.multi_reduction <maximumf>, %19, %cst_9 [1] : vector<1x8x8xf32> to vector<1x8xf32>
    %21 = vector.shape_cast %20 : vector<1x8xf32> to vector<1x1x8xf32>
    %22 = vector.broadcast %21 : vector<1x1x8xf32> to vector<1x8x8xf32>
    %23 = arith.subf %19, %22 : vector<1x8x8xf32>
    %24 = math.exp %23 : vector<1x8x8xf32>
    %cst_10 = arith.constant dense<0.000000e+00> : vector<1x8xf32>
    %25 = vector.multi_reduction <add>, %24, %cst_10 [1] : vector<1x8x8xf32> to vector<1x8xf32>
    %26 = vector.shape_cast %25 : vector<1x8xf32> to vector<1x1x8xf32>
    %27 = tpu.reciprocal %26 {approx = true} : vector<1x1x8xf32> -> vector<1x1x8xf32>
    %28 = vector.broadcast %27 : vector<1x1x8xf32> to vector<1x8x8xf32>
    %29 = arith.mulf %24, %28 : vector<1x8x8xf32>
    %30 = arith.truncf %29 : vector<1x8x8xf32> to vector<1x8x8xbf16>
    %31 = arith.truncf %3 : vector<1x8x128xf32> to vector<1x8x128xbf16>
    "tpu.trace_start"() <{level = 10 : i32, message = "bij,bjo->bio"}> : () -> ()
    %cst_11 = arith.constant dense<0.000000e+00> : vector<1x8x128xf32>
    %32 = tpu.matmul %30, %31, %cst_11 {dimension_numbers = #tpu.dot_dimension_numbers<[2], [1], [1], [2], [0, 0, 0, 1, 1, 2], [0], [0]>} : vector<1x8x8xbf16>, vector<1x8x128xbf16>, vector<1x8x128xf32> -> vector<1x8x128xf32>
    %cst_12 = arith.constant 0.000000e+00 : f32
    "tpu.trace_stop"() : () -> ()
    %33 = vector.broadcast %cst_12 : f32 to vector<1x8x128xf32>
    %34 = arith.cmpf ogt, %32, %33 : vector<1x8x128xf32>
    %cst_13 = arith.constant 0.000000e+00 : f32
    %35 = vector.broadcast %cst_13 : f32 to vector<1x8x128xf32>
    %36 = arith.minimumf %32, %35 : vector<1x8x128xf32>
    %37 = math.exp %36 : vector<1x8x128xf32>
    %cst_14 = arith.constant 1.000000e+00 : f32
    %38 = vector.broadcast %cst_14 : f32 to vector<1x8x128xf32>
    %39 = arith.subf %37, %38 : vector<1x8x128xf32>
    %40 = arith.select %34, %32, %39 : vector<1x8x128xi1>, vector<1x8x128xf32>
    %c0_15 = arith.constant 0 : index
    %c0_16 = arith.constant 0 : index
    %c0_17 = arith.constant 0 : index
    %41 = vector.load %arg4[%c0_15, %c0_16, %c0_17] : memref<1x8x128xf32, #tpu.memory_space<vmem>>, vector<1x8x128xf32>
    tpu.vector_store %arg4[%c0_15, %c0_16, %c0_17], %40 {strides = array<i32>} : memref<1x8x128xf32, #tpu.memory_space<vmem>>, vector<1x8x128xf32>,
    return
  }
  func.func @transform_0(%arg0: i32) -> (i32, i32) {
    %c0_i32 = arith.constant 0 : i32
    %c0_i32_0 = arith.constant 0 : i32
    return %arg0, %c0_i32 : i32, i32
  }
  func.func @transform_1(%arg0: i32) -> (i32, i32, i32) {
    %c0_i32 = arith.constant 0 : i32
    %c0_i32_0 = arith.constant 0 : i32
    %c0_i32_1 = arith.constant 0 : i32
    return %arg0, %c0_i32, %c0_i32_0 : i32, i32, i32
  }
  func.func @transform_2(%arg0: i32) -> (i32, i32) {
    %c0_i32 = arith.constant 0 : i32
    %c0_i32_0 = arith.constant 0 : i32
    %c0_i32_1 = arith.constant 0 : i32
    return %c0_i32, %c0_i32_0 : i32, i32
  }
  func.func @transform_3(%arg0: i32) -> (i32, i32, i32) {
    %c0_i32 = arith.constant 0 : i32
    %c0_i32_0 = arith.constant 0 : i32
    %c0_i32_1 = arith.constant 0 : i32
    return %arg0, %c0_i32, %c0_i32_0 : i32, i32, i32
  }
}

</mosaic_0001>

<bundles_post_ra>
// kernel: tpu_custom_call.1
= control target key start
LH: loop header
LB: loop body
LE: loop exit
PB: predicated region body
PF: predicated region fallthrough
CT: control target
= control target key end

     0   :  { %8 = vsyncpa [#allocation3], 0  ;;  %s1051_s0 = inlined_call_operand.hbm [shape: bf16[16,16], index: 0, kind: input, shape index: {}]   ;;  %s1052_s1 = inlined_call_operand.hbm [shape: s8[2,8,8], index: 1, kind: input, shape index: {}]   ;;  %s1053_s2 = inlined_call_operand.hbm [shape: bf16[16,128], index: 2, kind: input, shape index: {}]   ;;  %s1054_s3 = inlined_call_operand.hbm [shape: f32[2,8,128], index: 3, kind: output, shape index: {}]  }
   0x1   :  { %10 = vsyncpa [#allocation3 + $0x1], 0 }
   0x2   :  { %11 = vsyncpa [#allocation6], 0 }
   0x3   :  { %13 = vsyncpa [#allocation6 + $0x1], 0 }
   0x4   :  { %14 = vsyncpa [#allocation4], 0 }
   0x5   :  { %16 = vsyncpa [#allocation4 + $0x1], 0  ;;  %s840_s12 = smov 0   ;;  %s842_s13 = smov 0  }
   0x6   :  { %s844_s14 = smov 0   ;;  %s846_s15 = smov 0  }
   0x7 LB: > { %s861_s16 = sadd.s32 4294967295, %s807_s15   ;;  %s539_s17 = sadd.s32 4294967294, %s807_s15   ;;  %s807_s15 = sphi %s846_s15, %s1076_s15   ;;  %s803_s14 = sphi %s844_s14, %s1075_s14   ;;  %s799_s13 = sphi %s842_s13, %s1074_s13   ;;  %s795_s12 = sphi %s840_s12, %s1073_s12  }
   0x8   : > { %p42_p0 = scmp.ne.s32.totalorder %s799_s13, %s795_s12  ;;  %p1055_p1 = scmp.eq.s32.totalorder %s861_s16, 0 }
   0x9   : > { %p119_p3 = scmp.eq.s32.totalorder %s539_s17, 1  ;;  %p540_p5 = scmp.ge.s32.totalorder %s807_s15, 1 }
   0xa   : > { %p870_p4 = por %p1055_p1, %p42_p0  ;;  %p126_p7 = scmp.lt.s32.totalorder %s807_s15, 3 }
   0xb   : > { %p875_p6 = por %p119_p3, %p42_p0  ;;  %s809_s21 = smov [#allocation7]  }
   0xc   : > { %s1059_s18 = scalar_select %p870_p4, 1, 0 }
   0xd   : > { %s1060_s19 = scalar_select %p875_p6, 1, 0 }
   0xe   : > { %p880_p8 = pnand %p540_p5, %p126_p7  ;;  %s138_s22 = sshll.u32 %s809_s21, 4  ;;  %s139_s22 = int_to_ptr.vmem [resolvable:$true] %s138_s22 }
   0xf   : > { %s894_s24 = sadd.s32 1, %s807_s15   ;;  %s29_s25 = sadd.s32 1, %s803_s14 }
  0x10   : > { %s1061_s20 = scalar_select %p880_p8, 1, 0 }
  0x11   : > { %p586_p9 = pneg %p880_p8  ;;  %s26_s26 = ssub.s32 %s807_s15, %s894_s24 }
  0x12   : > { %s664_s27 = scalar_lea.vmem %s139_s22, 128  ;;  %p672_p5 = scmp.lt.s32.totalorder %s139_s22, %s139_s22 }
  0x13   : > { %p889_p11 = pnand %p586_p9, %p1055_p1  ;;  %p665_p13 = scmp.ne.s32.totalorder %s139_s22, %s664_s27 }
  0x14   : > { %p673_p7 = scmp.lt.s32.totalorder %s664_s27, %s664_s27 }
  0x15   : > { %p655_p12 = pneg %p889_p11 }
  0x16   : > { %p674_p10 = por %p673_p7, %p672_p5 }
  0x17   : > { %p667_p0 = pnand %p665_p13, %p655_p12 }
  0x19   : > { %p668_p3 = pneg %p667_p0 }
  0x1b   : > { %p675_p2 = pnand %p674_p10, %p668_p3 }
  0x1d   : > { %678 = shalt.err (!%p675_p2)
}
  0x1e   : > { %s810_s28 = smov 64   ;;  %s811_s29 = smov 4  }
  0x1f   : > { %589 = dma.hbm_to_vmem [thread:$0]  (!%p889_p11), %s1053_s2, 128, %s139_s22, [#allocation6], %s810_s28, %s810_s28, %s811_s29  }
  0x20   : > { %p27_p9 = scmp.eq.s32.totalorder %s26_s26, 0  ;;  %p36_p10 = scmp.ne.s32.totalorder %s803_s14, %s799_s13 }
  0x21   : > { %p37_p2 = scmp.eq.s32.totalorder %s807_s15, 0  ;;  %p602_p12 = scmp.lt.s32.totalorder %s807_s15, 2 }
  0x22   : > { %s911_s5 = scalar_select %p27_p9, %s803_s14, %s29_s25  }
  0x23   : > { %p38_p13 = por %p37_p2, %p36_p10  ;;  %p1063_p0 = scmp.eq.s32.totalorder %s861_s16, 1 }
  0x24   : > { %s920_s7 = sand.u32 1, %s803_s14   ;;  %s544_s8 = sshll.u32 %s807_s15, 6 }
  0x25   : > { %p915_p3 = por %p1063_p0, %p36_p10  ;;  %s543_s9 = sshll.u32 %s920_s7, 2 }
  0x26   : > { %s927_s17 = scalar_lea.hbm %s1051_s0, %s544_s8  ;;  %s156_s21 = scalar_lea.vmem [#allocation2], %s543_s9 }
  0x27   : > { %s1064_s6 = scalar_select %p915_p3, 1, 0 }
  0x28   : > { %s163_s22 = sshll.u32 %s156_s21, 4  ;;  %p929_p11 = pnand %p602_p12, %p38_p13  ;;  %s164_s22 = int_to_ptr.vmem [resolvable:$true] %s163_s22 }
  0x29   : > { %s170_s25 = sand.u32 1, %s807_s15   ;;  %s153_s26 = scalar_lea.sflag [#allocation3], %s920_s7 }
  0x2a   : > { %s679_s27 = scalar_lea.hbm %s927_s17, 64  ;;  %p681_p7 = pneg %p929_p11 }
  0x2b   : > { %p680_p5 = scmp.ne.s32.totalorder %s927_s17, %s679_s27  ;;  %s684_s30 = scalar_lea.hbm %s1051_s0, 128 }
  0x2c   : > { %p685_p2 = scmp.lt.s32.totalorder %s927_s17, %s1051_s0  ;;  %p686_p12 = scmp.lt.s32.totalorder %s684_s30, %s679_s27 }
  0x2d   : > { %p682_p9 = pnand %p681_p7, %p680_p5 }
  0x2e   : > { %p687_p13 = por %p686_p12, %p685_p2 }
  0x2f   : > { %p683_p10 = pneg %p682_p9 }
  0x31   : > { %p688_p0 = pnand %p687_p13, %p683_p10 }
  0x33   : > { %691 = shalt.err (!%p688_p0)
}
  0x34   : > { %s692_s9 = scalar_lea.vmem %s164_s22, 64  ;;  %s812_s10 = smov [#allocation2]  }
  0x35   : > { %p693_p1 = scmp.ne.s32.totalorder %s164_s22, %s692_s9  ;;  %s697_s11 = sshll.u32 %s812_s10, 4  ;;  %s698_s11 = int_to_ptr.vmem [resolvable:$false] %s697_s11 }
  0x36   : > { %s699_s21 = scalar_lea.vmem %s698_s11, 128  ;;  %p700_p9 = scmp.lt.s32.totalorder %s164_s22, %s698_s11 }
  0x37   : > { %p695_p6 = pnand %p693_p1, %p681_p7  ;;  %p701_p3 = scmp.lt.s32.totalorder %s699_s21, %s692_s9 }
  0x39   : > { %p696_p5 = pneg %p695_p6  ;;  %p702_p4 = por %p701_p3, %p700_p9 }
  0x3b   : > { %p703_p8 = pnand %p702_p4, %p696_p5 }
  0x3d   : > { %706 = shalt.err (!%p703_p8)
}
  0x3e   : > { %593 = dma.hbm_to_vmem [thread:$0]  (!%p929_p11), %s927_s17, 64, %s164_s22, %s153_s26  }
  0x3f   : > { %s545_s27 = sshll.u32 %s920_s7, 1  ;;  %s546_s28 = sshll.u32 %s807_s15, 5 }
  0x40   : > { %s960_s4 = scalar_lea.hbm %s1052_s1, %s546_s28  ;;  %s174_s8 = scalar_lea.vmem [#allocation5], %s545_s27 }
  0x41   : > { %s181_s9 = sshll.u32 %s174_s8, 4  ;;  %s171_s10 = scalar_lea.sflag [#allocation6], %s170_s25  ;;  %s182_s9 = int_to_ptr.vmem [resolvable:$true] %s181_s9 }
  0x42   : > { %s707_s11 = scalar_lea.hbm %s960_s4, 32  ;;  %s712_s22 = scalar_lea.hbm %s1052_s1, 64 }
  0x43   : > { %p708_p1 = scmp.ne.s32.totalorder %s960_s4, %s707_s11  ;;  %p713_p8 = scmp.lt.s32.totalorder %s960_s4, %s1052_s1 }
  0x44   : > { %p714_p3 = scmp.lt.s32.totalorder %s712_s22, %s707_s11 }
  0x45   : > { %p710_p4 = pnand %p708_p1, %p681_p7 }
  0x46   : > { %p715_p10 = por %p714_p3, %p713_p8 }
  0x47   : > { %p711_p6 = pneg %p710_p4 }
  0x49   : > { %p716_p2 = pnand %p715_p10, %p711_p6 }
  0x4b   : > { %719 = shalt.err (!%p716_p2)
}
  0x4c   : > { %s720_s27 = scalar_lea.vmem %s182_s9, 32  ;;  %s813_s25 = smov [#allocation5]  }
  0x4d   : > { %p721_p12 = scmp.ne.s32.totalorder %s182_s9, %s720_s27  ;;  %s725_s28 = sshll.u32 %s813_s25, 4  ;;  %s726_s28 = int_to_ptr.vmem [resolvable:$false] %s725_s28 }
  0x4e   : > { %s727_s29 = scalar_lea.vmem %s726_s28, 64  ;;  %p728_p5 = scmp.lt.s32.totalorder %s182_s9, %s726_s28 }
  0x4f   : > { %p723_p13 = pnand %p721_p12, %p681_p7  ;;  %p729_p9 = scmp.lt.s32.totalorder %s727_s29, %s720_s27 }
  0x51   : > { %p724_p0 = pneg %p723_p13  ;;  %p730_p1 = por %p729_p9, %p728_p5 }
  0x53   : > { %p731_p4 = pnand %p730_p1, %p724_p0 }
  0x55   : > { %734 = shalt.err (!%p731_p4)
}
  0x56   : > { %596 = dma.hbm_to_vmem [thread:$0]  (!%p929_p11), %s960_s4, 32, %s182_s9, %s171_s10  }
  0x57   : > { %p1066_p6 = scmp.ne.s32.totalorder %s1061_s20, 0 }
  0x58   : > { %s985_s30 = sand.u32 (!%p1066_p6), 1, %s799_s13   ;;  %p1067_p7 = scmp.ne.s32.totalorder (!%p1066_p6), %s1059_s18, 0 }
  0x59   : > { %190 = sbr.rel (%p1066_p6) target bundleno = 837 (0x345), region = 32  ;;  %s548_s8 = sshll.u32 (!%p1066_p6), %s985_s30, 2 }
  0x5a   : > { %s193_s11 = scalar_lea.sflag (!%p1066_p6), [#allocation3], %s985_s30  ;;  %s196_s7 = scalar_lea.vmem (!%p1066_p6), [#allocation2], %s548_s8 }
  0x5e   : > { %778 = dma.done.wait (%p1067_p7), %s193_s11, 64  }
  0x5f   : > { %780 = vsyncadd (%p1067_p7), %s193_s11, 4294967232  ;;  %s201_s23 = sand.u32 1, %s861_s16   ;;  %s549_s20 = sshll.u32 %s985_s30, 1 }
  0x60   : > { %s202_s4 = scalar_lea.sflag [#allocation6], %s201_s23  ;;  %s995_s9 = scalar_lea.vmem [#allocation5], %s549_s20 }
  0x61   : > { %782 = dma.done.wait (%p1067_p7), %s202_s4, 32  }
  0x62   : > { %784 = vsyncadd (%p1067_p7), %s202_s4, 4294967264  ;;  %p1068_p11 = scmp.eq.s32.totalorder %s861_s16, 0 }
  0x64   : > { %786 = dma.done.wait (%p1068_p11), [#allocation6], 128   ;;  %p1069_p8 = pmov %p1068_p11 }
  0x65   : > { %v814_v0 = vmov 0.0   ;;  %vm815_vm0 = vmmov 0   ;;  %v646_v1 = vld [vmem:[#allocation7] sm:$0xff]   ;;  %v240_v2 = vld [vmem:[%s196_s7] sm:$0xf]  ;;  %vm249_vm1 = vcmask 130048   ;;  %v333_v11 = vlaneseq }
  0x66   : > { %788 = vsyncadd (%p1069_p8), [#allocation6], 4294967168  ;;  %564 = vmatprep.subr.bf16.mxu0 %v814_v0  ;;  %566 = vmatprep.mubr.msk.bf16.mxu0 %vm815_vm0, %v814_v0  ;;  %v816_v3 = vmov 32   ;;  %vm372_vm2 = vcmask 1043456   ;;  %s817_s18 = smov 95   ;;  %v818_v15 = vmov 0  }
  0x67   : > { %570 = vmatprep.subr.bf16.mxu1 %v814_v0  ;;  %572 = vmatprep.mubr.msk.bf16.mxu1 %vm815_vm0, %v814_v0  ;;  %v341_v12 = vld [vmem:[%s995_s9] sm:$0x3]  ;;  %v334_v13 = vshrl.u32 %v333_v11, 7  ;;  %vm347_vm6 = vcmask 64512   ;;  %s551_s10 = sshll.u32 %s985_s30, 3  ;;  %s557_s17 = sshll.u32 %s861_s16, 7 }
  0x68   : > { %565 = vmatpush3.bf16.msra.mxu0 %v646_v1  ;;  %645 = vset.pattern.permute.xlu0 %v816_v3  ;;  %vm342_vm3 = vnez %v341_v12  ;;  %s236_s22 = scalar_lea.vmem [#allocation8], %s551_s10  ;;  %s1014_s25 = scalar_lea.hbm %s1054_s3, %s557_s17 }
  0x69   : > { %v335_v14 = vsub.s32 0, %v334_v13  ;;  %v343_v16 = vsel %vm342_vm3, 16843009, %v818_v15  ;;  %s437_s26 = sshll.u32 %s236_s22, 4  ;;  %s424_s28 = scalar_lea.sflag [#allocation4], %s985_s30  ;;  %s438_s26 = int_to_ptr.vmem [resolvable:$true] %s437_s26 }
  0x6a   : > { %v344_v19 = vunpack.c.0.s8 %v343_v16  ;;  %s735_s29 = scalar_lea.vmem %s438_s26, 128  ;;  %p1070_p10 = scmp.ne.s32.totalorder %s1064_s6, 0 }
  0x6b   : > { %567 = vmatmul.mubr.msk.bf16.vlgmr.msra.gmra.mxu0 %vm249_vm1, %v240_v2  ;;  %p736_p3 = scmp.ne.s32.totalorder %s438_s26, %s735_s29  ;;  %s819_s16 = smov [#allocation8]  }
  0x6c   : > { %vm345_vm5 = vcmp.ne.s32.totalorder %v344_v19, 0  ;;  %s739_s8 = sshll.u32 %s819_s16, 4  ;;  %s740_s8 = int_to_ptr.vmem [resolvable:$false] %s739_s8 }
  0x6d   : > { %p737_p2 = pnand %p736_p3, %p1070_p10  ;;  %s741_s11 = scalar_lea.vmem %s740_s8, 256 }
  0x6e   : > { %p742_p13 = scmp.lt.s32.totalorder %s438_s26, %s740_s8  ;;  %p743_p0 = scmp.lt.s32.totalorder %s741_s11, %s735_s29 }
  0x6f   : > { %p738_p12 = pneg %p737_p2 }
  0x70   : > { %p744_p5 = por %p743_p0, %p742_p13 }
  0x72   : > { %p745_p9 = pnand %p744_p5, %p738_p12 }
 0x12b   : > { %v287_v4 = vpop.f32.mrf.mxu0 }
 0x12c   : > { %294 = vrot.lane.b32.xlu0 %v287_v4, %s817_s18  ;;  %v368_v5 = vpack.c.bf16 %v287_v4, %v287_v4 }
 0x12d   : > { %v568_v6 = vpop.f32.mrf.mxu0 }
 0x12e   : > { %v374_v7 = vsel %vm372_vm2, %v368_v5, 0 }
 0x12f   : > { %v290_v8 = vpop.f32.mrf.mxu0  ;;  %571 = vmatpush3.bf16.msra.mxu1 %v374_v7 }
 0x130   : > { %330 = vperm.xlu0 %645, %v287_v4  }
 0x131   : > { %v569_v9 = vpop.f32.mrf.mxu0 }
 0x19e   : > { %v295_v10 = vpop.permute.xlu0 %294 }
 0x19f   : > { %297 = vxpose.xlu1.b32.start.end [1/1] (short) (narrow) %v295_v10, 8 }
 0x1ab   : > { %v331_v20 = vpop.permute.xlu0 %330 }
 0x21b   : > { %v313_v17 = vpop.trf.xlu1 }
 0x21c   : > { %v336_v18 = vrot.slane %v313_v17, %v335_v14 }
 0x21e   : > { %v337_v21 = vadd.f32 %v336_v18, %v331_v20 }
 0x220   : > { %vm338_vm4 = vcmp.gt.f32.partialorder %v337_v21, 0.0  ;;  %v339_v22 = vmul.f32 0.2, %v337_v21 }
 0x222   : > { %v340_v23 = vsel %vm338_vm4, %v337_v21, %v339_v22 }
 0x223   : > { %v346_v24 = vsel %vm345_vm5, %v340_v23, 0.0 }
 0x224   : > { %v348_v25 = vsel %vm347_vm6, %v346_v24, -inf }
 0x225   : > { %v349_v26 = vrot.slane %v348_v25, 4 }
 0x227   : > { %v350_v27 = vmax.f32 %v348_v25, %v349_v26 }
 0x229   : > { %v351_v28 = vrot.slane %v350_v27, 2 }
 0x22b   : > { %v352_v29 = vmax.f32 %v350_v27, %v351_v28 }
 0x22d   : > { %v353_v30 = vrot.slane %v352_v29, 1 }
 0x22f   : > { %v354_v31 = vmax.f32 %v352_v29, %v353_v30 }
 0x231   : > { %v355_v32 = vsub.f32 %v346_v24, %v354_v31 }
 0x233   : > { %v356_v33 = vmul.f32 1.442695, %v355_v32 }
 0x235   : > { %647 = vpow2.f32 %v356_v33 }
 0x242   : > { %v648_v34 = vpop.eup %647 }
 0x243   : > { %v358_v35 = vsel %vm347_vm6, %v648_v34, 0.0 }
 0x244   : > { %v359_v36 = vrot.slane %v358_v35, 4 }
 0x246   : > { %v360_v37 = vadd.f32 %v359_v36, %v358_v35 }
 0x248   : > { %v361_v38 = vrot.slane %v360_v37, 2 }
 0x24a   : > { %v362_v39 = vadd.f32 %v361_v38, %v360_v37 }
 0x24c   : > { %v363_v40 = vrot.slane %v362_v39, 1 }
 0x24e   : > { %v364_v41 = vadd.f32 %v363_v40, %v362_v39 }
 0x250   : > { %649 = vrcp.f32 %v364_v41 }
 0x25d   : > { %v650_v42 = vpop.eup %649 }
 0x25e   : > { %v366_v43 = vmul.f32 %v650_v42, %v648_v34 }
 0x260   : > { %v367_v44 = vpack.c.bf16 %v366_v43, %v366_v43 }
 0x262   : > { %573 = vmatmul.mubr.msk.bf16.vlgmr.msra.gmra.mxu1 %vm347_vm6, %v367_v44 }
 0x322   : > { %v410_v45 = vpop.f32.mrf.mxu1 }
 0x323   : > { %v417_v46 = vmin.f32 %v410_v45, 0.0  ;;  %vm416_vm7 = vcmp.gt.f32.partialorder %v410_v45, 0.0 }
 0x324   : > { %v574_v47 = vpop.f32.mrf.mxu1 }
 0x325   : > { %v418_v48 = vmul.f32 1.442695, %v417_v46 }
 0x326   : > { %v413_v49 = vpop.f32.mrf.mxu1 }
 0x327   : > { %651 = vpow2.f32 %v418_v48 }
 0x328   : > { %v575_v50 = vpop.f32.mrf.mxu1 }
 0x334   : > { %v652_v51 = vpop.eup %651 }
 0x335   : > { %v555_v52 = vadd.f32 -1.0, %v652_v51 }
 0x337   : > { %v421_v53 = vsel %vm416_vm7, %v410_v45, %v555_v52 }
 0x338   : > { %422 = vst [vmem:[%s236_s22] sm:$0xff] %v421_v53 }
 0x339   : > { %748 = shalt.err (!%p745_p9)
}
 0x33a   : > { %s749_s7 = scalar_lea.hbm %s1014_s25, 128  ;;  %s753_s20 = scalar_lea.hbm %s1054_s3, 256 }
 0x33b   : > { %p750_p1 = scmp.ne.s32.totalorder %s1014_s25, %s749_s7  ;;  %p754_p7 = scmp.lt.s32.totalorder %s1014_s25, %s1054_s3 }
 0x33c   : > { %p755_p11 = scmp.lt.s32.totalorder %s753_s20, %s749_s7 }
 0x33d   : > { %p751_p4 = pnand %p750_p1, %p1070_p10 }
 0x33e   : > { %p756_p8 = por %p755_p11, %p754_p7 }
 0x33f   : > { %p752_p6 = pneg %p751_p4 }
 0x341   : > { %p757_p3 = pnand %p756_p8, %p752_p6 }
 0x343   : > { %760 = shalt.err (!%p757_p3)
}
 0x344   : > { %584 = dma.vmem_to_hbm [thread:$0]  (%p1070_p10), %s438_s26, 128, %s1014_s25, %s424_s28  }
 0x345 PF: > { %s449_s18 = sand.u32 1, %s795_s12   ;;  %p1071_p2 = scmp.ne.s32.totalorder %s1060_s19, 0 }
 0x346   : > { %p1072_p12 = scmp.ge.s32.totalorder %s807_s15, 2  ;;  %s450_s10 = scalar_lea.sflag [#allocation4], %s449_s18 }
 0x348   : > { %p598_p13 = pnand %p1072_p12, %p1071_p2 }
 0x34a   : > { %p599_p0 = pneg %p598_p13 }
 0x34c   : > { %790 = dma.done.wait (%p599_p0), %s450_s10, 128  }
 0x34d   : > { %792 = vsyncadd (%p599_p0), %s450_s10, 4294967168  ;;  %p19_p5 = scmp.ge.s32.totalorder %s894_s24, 4   ;;  %s1073_s12 = smov %s799_s13 }
 0x34e   : > { %s1074_s13 = smov %s803_s14  ;;  %s1075_s14 = smov %s911_s5 }
 0x34f   : > { %s1076_s15 = smov %s894_s24  ;;  %21 = sbr.rel (!%p19_p5) target bundleno = 7 (0x7), region = 94 }
 0x354   :  { %455 = vsyncpa [#allocation3], 1 }
 0x355   :  { %457 = vsyncpa [#allocation3 + $0x1], 1 }
 0x356   :  { %458 = vsyncpa [#allocation6], 1 }
 0x357   :  { %460 = vsyncpa [#allocation6 + $0x1], 1 }
 0x358   :  { %461 = vsyncpa [#allocation4], 1 }
 0x359   :  { %463 = vsyncpa [#allocation4 + $0x1], 1 }

</bundles_post_ra>
